<compile_context>
chip_gen: v6e
topology: v6e:2x2x1
jax: 0.10.0
libtpu: 0.0.40
codegen_flags: <defaults>
</compile_context>

<pallas_src>
import functools

import jax
import jax.numpy as jnp
from jax import lax
from jax.experimental import pallas as pl
from jax.experimental.pallas import tpu as pltpu


def _round_up(a: int, m: int) -> int:
    return (a + m - 1) // m * m


def _cam_kernel(gamma_ref, x_ref, o_ref, energy_acc, attn_ref, scale_ref,
                *, c_real: int, compute_dtype):
    """One grid step.

    grid = (B, 2, n_hw_tiles); axis 1 is the pass index:
      pass 0: accumulate energy += X_t @ X_t^T
      pass 1 (t == 0): softmax once; all t: out_t = scale * (P @ X_t) + X_t
    """
    p = pl.program_id(1)   # 0: energy accumulation, 1: apply attention
    t = pl.program_id(2)   # HW tile index

    x = x_ref[...]         # (C_pad, hw_tile), activation dtype

    # ---------------- pass 0: energy accumulation over HW tiles -------------
    @pl.when(p == 0)
    def _():
        @pl.when(t == 0)
        def _():
            energy_acc[...] = jnp.zeros_like(energy_acc)

        xc = x.astype(compute_dtype)
        # energy[i, j] += sum_k X[i, k] * X[j, k]   (X @ X^T, no transpose op)
        energy_acc[...] += lax.dot_general(
            xc, xc,
            dimension_numbers=(((1,), (1,)), ((), ())),
            preferred_element_type=jnp.float32,
        )

    # ------------- softmax (once per batch, at first pass-1 step) -----------
    @pl.when(jnp.logical_and(p == 1, t == 0))
    def _():
        energy = energy_acc[...]                      # (C_pad, C_pad) f32
        c_pad = energy_acc.shape[0]
        if c_real != c_pad:
            # Zero-padded channels must not receive softmax mass: push their
            # energy to +big so exp(row_min - energy) underflows to 0.
            col = lax.broadcasted_iota(jnp.int32, (c_pad, c_pad), 1)
            energy = jnp.where(col < c_real, energy, jnp.float32(1e30))

        # softmax(rowmax(E) - E) == softmax(-E); stable form needs only a
        # single row-min reduction (identical values to the two-step form).
        row_min = jnp.min(energy, axis=-1, keepdims=True)
        p_un = jnp.exp(row_min - energy)              # unnormalized, in (0, 1]
        denom = jnp.sum(p_un, axis=-1, keepdims=True)

        attn_ref[...] = p_un.astype(compute_dtype)
        # Fold softmax normalization and gamma into one per-row scale
        # (EUP reciprocal; removes the (C, C) VPU division pass entirely).
        scale_ref[...] = gamma_ref[0] * pl.reciprocal(denom, approx=True)

    # ---------------- pass 1: apply attention to this HW tile ---------------
    @pl.when(p == 1)
    def _():
        out = jnp.dot(attn_ref[...], x.astype(compute_dtype),
                      preferred_element_type=jnp.float32)   # (C_pad, hw_tile)
        o_ref[...] = (scale_ref[...] * out
                      + x.astype(jnp.float32)).astype(o_ref.dtype)


def cam_module(x, gamma, *, compute_dtype=None, hw_tile_target=2048):
    """Channel attention module forward.

    x: (B, C, H, W), gamma: (1,)  ->  (B, C, H, W)
    compute_dtype: dtype used for the two MXU matmuls (f32 accumulation kept).
        Defaults to x.dtype; pass jnp.bfloat16 (or feed bf16 activations) for
        MXU-native throughput on v6e/v7x.
    """
    B, C, H, W = x.shape
    HW = H * W
    compute_dtype = jnp.dtype(x.dtype if compute_dtype is None else compute_dtype)

    # Pad C to a sublane multiple; pad HW to a 128-multiple tile.
    c_pad = _round_up(C, 8)
    hw_tile = min(_round_up(HW, 128), _round_up(int(hw_tile_target), 128))
    hw_pad = _round_up(HW, hw_tile)
    n_t = hw_pad // hw_tile

    x_flat = x.reshape(B, C, HW)
    if (c_pad, hw_pad) != (C, HW):
        x_flat = jnp.pad(x_flat, ((0, 0), (0, c_pad - C), (0, hw_pad - HW)))

    kernel = functools.partial(_cam_kernel, c_real=C, compute_dtype=compute_dtype)

    itemsize = jnp.dtype(x.dtype).itemsize
    cost = pl.CostEstimate(
        flops=4 * B * c_pad * c_pad * hw_pad,            # two (C,C,HW) matmuls
        transcendentals=B * c_pad * c_pad,               # exp over (C,C)
        bytes_accessed=3 * B * c_pad * hw_pad * itemsize,  # X read x2 + out
    )

    out_flat = pl.pallas_call(
        kernel,
        out_shape=jax.ShapeDtypeStruct((B, c_pad, hw_pad), x.dtype),
        grid=(B, 2, n_t),
        in_specs=[
            pl.BlockSpec(memory_space=pltpu.SMEM),                    # gamma
            pl.BlockSpec((pl.Squeezed(), c_pad, hw_tile),
                         lambda b, p, t: (b, 0, t)),                  # X tile
        ],
        # In pass 0 the output block index stays pinned at (b, 0); the first
        # pass-1 step writes that block before it is ever flushed to HBM.
        out_specs=pl.BlockSpec((pl.Squeezed(), c_pad, hw_tile),
                               lambda b, p, t: (b, 0, p * t)),
        scratch_shapes=[
            pltpu.VMEM((c_pad, c_pad), jnp.float32),     # energy accumulator
            pltpu.VMEM((c_pad, c_pad), compute_dtype),   # unnormalized attention
            pltpu.VMEM((c_pad, 1), jnp.float32),         # gamma / row-sum scale
        ],
        compiler_params=pltpu.CompilerParams(
            dimension_semantics=("parallel", "arbitrary", "arbitrary"),
        ),
        cost_estimate=cost,
    )(gamma, x_flat)

    return out_flat[:, :C, :HW].reshape(B, C, H, W)


def cam_reference(x, gamma, compute_dtype=None):
    """Pure-JAX reference mirroring the PyTorch forward.

    With compute_dtype set, mirrors the kernel's mixed-precision matmuls
    (low-precision operands, f32 accumulation) for a fair comparison.
    """
    B, C, H, W = x.shape
    Xf = x.reshape(B, C, H * W).astype(jnp.float32)
    Xc = Xf if compute_dtype is None else Xf.astype(compute_dtype)
    energy = jnp.einsum("bch,bdh->bcd", Xc, Xc,
                        preferred_element_type=jnp.float32)
    energy_new = jnp.max(energy, axis=-1, keepdims=True) - energy
    attention = jax.nn.softmax(energy_new, axis=-1)
    attn_c = attention if compute_dtype is None else attention.astype(compute_dtype)
    out = jnp.einsum("bcd,bdh->bch", attn_c, Xc,
                     preferred_element_type=jnp.float32).reshape(B, C, H, W)
    return (gamma[0] * out + x.astype(jnp.float32)).astype(x.dtype)


if __name__ == "__main__":
    key = jax.random.PRNGKey(0)
    B, C, H, W = 2, 4, 16, 16
    x = jax.random.normal(key, (B, C, H, W), dtype=jnp.float32)

    # gamma init per nn.Module __init__: zeros(1) -> output must equal x exactly.
    gamma0 = jnp.zeros((1,), dtype=jnp.float32)
    out0 = jax.block_until_ready(cam_module(x, gamma0, hw_tile_target=128))
    assert out0.shape == (B, C, H, W)
    assert jnp.allclose(out0, x, atol=1e-6, rtol=1e-6)

    # Non-trivial gamma exercises the full energy/softmax/attention hot path
    # (hw_tile_target=128 -> 2 HW tiles, exercising the energy accumulation).
    gamma = jnp.array([0.5], dtype=jnp.float32)
    out = jax.block_until_ready(cam_module(x, gamma, hw_tile_target=128))
    ref = cam_reference(x, gamma)
    # Tolerance covers the approximate EUP reciprocal used in the softmax scale.
    err = float(jnp.max(jnp.abs(out - ref)))
    assert jnp.allclose(out, ref, atol=2e-2, rtol=2e-2), f"max |err| = {err}"

    # bf16 MXU matmuls (f32 accumulation) vs. a bf16-mirrored reference.
    out_bf = jax.block_until_ready(
        cam_module(x, gamma, compute_dtype=jnp.bfloat16, hw_tile_target=128))
    ref_bf = cam_reference(x, gamma, compute_dtype=jnp.bfloat16)
    err_bf = float(jnp.max(jnp.abs(out_bf - ref_bf)))
    assert jnp.allclose(out_bf, ref_bf, atol=3e-2, rtol=3e-2), f"max |err| = {err_bf}"

    print("KERNEL_OK")
</pallas_src>

<mosaic_0001>
module attributes {stable_mosaic.version = 11 : i64} {
  func.func @_cam_kernel(%arg0: i32, %arg1: i32, %arg2: i32, %arg3: memref<1xf32, #tpu.memory_space<smem>>, %arg4: memref<1x8x128xf32, #tpu.memory_space<vmem>>, %arg5: memref<1x8x128xf32, #tpu.memory_space<vmem>>, %arg6: memref<8x8xf32, #tpu.memory_space<vmem>>, %arg7: memref<8x8xf32, #tpu.memory_space<vmem>>, %arg8: memref<8x1xf32, #tpu.memory_space<vmem>>) attributes {dimension_semantics = [#tpu.dimension_semantics<parallel>, #tpu.dimension_semantics<arbitrary>, #tpu.dimension_semantics<arbitrary>], iteration_bounds = array<i64: 2, 2, 2>, scalar_prefetch = 0 : i64, scratch_operands = 3 : i64, tpu.core_type = #tpu.core_type<tc>, window_params = [{transform_indices = @transform_0, window_bounds = array<i64: 1>}, {transform_indices = @transform_1, window_bounds = array<i64: 1, 8, 128>}, {transform_indices = @transform_2, window_bounds = array<i64: 1, 8, 128>}]} {
    %c0 = arith.constant 0 : index
    %c0_0 = arith.constant 0 : index
    %c0_1 = arith.constant 0 : index
    %0 = vector.load %arg4[%c0, %c0_0, %c0_1] : memref<1x8x128xf32, #tpu.memory_space<vmem>>, vector<1x8x128xf32>
    %1 = vector.shape_cast %0 : vector<1x8x128xf32> to vector<8x128xf32>
    %c0_i32 = arith.constant 0 : i32
    %2 = arith.cmpi eq, %arg1, %c0_i32 : i32
    %3 = arith.extui %2 : i1 to i32
    %c0_i32_2 = arith.constant 0 : i32
    %4 = arith.cmpi ne, %3, %c0_i32_2 : i32
    scf.if %4 {
      %c0_i32_7 = arith.constant 0 : i32
      %13 = arith.cmpi eq, %arg2, %c0_i32_7 : i32
      %14 = arith.extui %13 : i1 to i32
      %c0_i32_8 = arith.constant 0 : i32
      %15 = arith.cmpi ne, %14, %c0_i32_8 : i32
      scf.if %15 {
        %cst_13 = arith.constant 0.000000e+00 : f32
        %20 = vector.broadcast %cst_13 : f32 to vector<8x8xf32>
        %c0_14 = arith.constant 0 : index
        %c0_15 = arith.constant 0 : index
        %21 = vector.load %arg6[%c0_14, %c0_15] : memref<8x8xf32, #tpu.memory_space<vmem>>, vector<8x8xf32>
        tpu.vector_store %arg6[%c0_14, %c0_15], %20 {strides = array<i32>} : memref<8x8xf32, #tpu.memory_space<vmem>>, vector<8x8xf32>,
      } else {
      }
      %c0_9 = arith.constant 0 : index
      %c0_10 = arith.constant 0 : index
      %16 = vector.load %arg6[%c0_9, %c0_10] : memref<8x8xf32, #tpu.memory_space<vmem>>, vector<8x8xf32>
      %cst = arith.constant dense<0.000000e+00> : vector<8x8xf32>
      %17 = tpu.matmul %1, %1, %cst {dimension_numbers = #tpu.dot_dimension_numbers<[1], [1], [0], [0], [0, 0, 1, 0], [], []>} : vector<8x128xf32>, vector<8x128xf32>, vector<8x8xf32> -> vector<8x8xf32>
      %18 = arith.addf %16, %17 : vector<8x8xf32>
      %c0_11 = arith.constant 0 : index
      %c0_12 = arith.constant 0 : index
      %19 = vector.load %arg6[%c0_11, %c0_12] : memref<8x8xf32, #tpu.memory_space<vmem>>, vector<8x8xf32>
      tpu.vector_store %arg6[%c0_11, %c0_12], %18 {strides = array<i32>} : memref<8x8xf32, #tpu.memory_space<vmem>>, vector<8x8xf32>,
    } else {
    }
    %c1_i32 = arith.constant 1 : i32
    %5 = arith.cmpi eq, %arg1, %c1_i32 : i32
    %c0_i32_3 = arith.constant 0 : i32
    %6 = arith.cmpi eq, %arg2, %c0_i32_3 : i32
    %7 = arith.andi %5, %6 : i1
    %8 = arith.extui %7 : i1 to i32
    %c0_i32_4 = arith.constant 0 : i32
    %9 = arith.cmpi ne, %8, %c0_i32_4 : i32
    scf.if %9 {
      %c0_7 = arith.constant 0 : index
      %c0_8 = arith.constant 0 : index
      %13 = vector.load %arg6[%c0_7, %c0_8] : memref<8x8xf32, #tpu.memory_space<vmem>>, vector<8x8xf32>
      %14 = tpu.iota {dimensions = array<i32: 1>} : vector<8x8xi32>
      %c4_i32 = arith.constant 4 : i32
      %15 = vector.broadcast %c4_i32 : i32 to vector<8x8xi32>
      %16 = arith.cmpi slt, %14, %15 : vector<8x8xi32>
      %cst = arith.constant 1.000000e+30 : f32
      %17 = vector.broadcast %cst : f32 to vector<8x8xf32>
      %18 = arith.select %16, %13, %17 : vector<8x8xi1>, vector<8x8xf32>
      %cst_9 = arith.constant dense<0x7F800000> : vector<8xf32>
      %19 = vector.multi_reduction <minimumf>, %18, %cst_9 [1] : vector<8x8xf32> to vector<8xf32>
      %20 = vector.shape_cast %19 : vector<8xf32> to vector<8x1xf32>
      %21 = vector.broadcast %20 : vector<8x1xf32> to vector<8x8xf32>
      %22 = arith.subf %21, %18 : vector<8x8xf32>
      %23 = math.exp %22 : vector<8x8xf32>
      %cst_10 = arith.constant dense<0.000000e+00> : vector<8xf32>
      %24 = vector.multi_reduction <add>, %23, %cst_10 [1] : vector<8x8xf32> to vector<8xf32>
      %25 = vector.shape_cast %24 : vector<8xf32> to vector<8x1xf32>
      %c0_11 = arith.constant 0 : index
      %c0_12 = arith.constant 0 : index
      %26 = vector.load %arg7[%c0_11, %c0_12] : memref<8x8xf32, #tpu.memory_space<vmem>>, vector<8x8xf32>
      tpu.vector_store %arg7[%c0_11, %c0_12], %23 {strides = array<i32>} : memref<8x8xf32, #tpu.memory_space<vmem>>, vector<8x8xf32>,
      %c0_13 = arith.constant 0 : index
      %27 = memref.load %arg3[%c0_13] : memref<1xf32, #tpu.memory_space<smem>>
      %28 = tpu.reciprocal %25 {approx = true} : vector<8x1xf32> -> vector<8x1xf32>
      %29 = vector.broadcast %27 : f32 to vector<8x1xf32>
      %30 = arith.mulf %29, %28 : vector<8x1xf32>
      %c0_14 = arith.constant 0 : index
      %c0_15 = arith.constant 0 : index
      %31 = vector.load %arg8[%c0_14, %c0_15] : memref<8x1xf32, #tpu.memory_space<vmem>>, vector<8x1xf32>
      tpu.vector_store %arg8[%c0_14, %c0_15], %30 {strides = array<i32>} : memref<8x1xf32, #tpu.memory_space<vmem>>, vector<8x1xf32>,
    } else {
    }
    %c1_i32_5 = arith.constant 1 : i32
    %10 = arith.cmpi eq, %arg1, %c1_i32_5 : i32
    %11 = arith.extui %10 : i1 to i32
    %c0_i32_6 = arith.constant 0 : i32
    %12 = arith.cmpi ne, %11, %c0_i32_6 : i32
    scf.if %12 {
      %c0_7 = arith.constant 0 : index
      %c0_8 = arith.constant 0 : index
      %13 = vector.load %arg7[%c0_7, %c0_8] : memref<8x8xf32, #tpu.memory_space<vmem>>, vector<8x8xf32>
      %cst = arith.constant dense<0.000000e+00> : vector<8x128xf32>
      %14 = tpu.matmul %13, %1, %cst {dimension_numbers = #tpu.dot_dimension_numbers<[1], [0], [0], [1], [0, 0, 1, 1], [], []>} : vector<8x8xf32>, vector<8x128xf32>, vector<8x128xf32> -> vector<8x128xf32>
      %c0_9 = arith.constant 0 : index
      %c0_10 = arith.constant 0 : index
      %15 = vector.load %arg8[%c0_9, %c0_10] : memref<8x1xf32, #tpu.memory_space<vmem>>, vector<8x1xf32>
      %16 = vector.broadcast %15 : vector<8x1xf32> to vector<8x128xf32>
      %17 = arith.mulf %16, %14 : vector<8x128xf32>
      %18 = arith.addf %17, %1 : vector<8x128xf32>
      %c0_11 = arith.constant 0 : index
      %c0_12 = arith.constant 0 : index
      %c0_13 = arith.constant 0 : index
      %19 = vector.load %arg5[%c0_11, %c0_12, %c0_13] : memref<1x8x128xf32, #tpu.memory_space<vmem>>, vector<1x8x128xf32>
      %20 = vector.shape_cast %19 : vector<1x8x128xf32> to vector<8x128xf32>
      %21 = vector.shape_cast %18 : vector<8x128xf32> to vector<1x8x128xf32>
      tpu.vector_store %arg5[%c0_11, %c0_12, %c0_13], %21 {strides = array<i32>} : memref<1x8x128xf32, #tpu.memory_space<vmem>>, vector<1x8x128xf32>,
    } else {
    }
    return
  }
  func.func @transform_0(%arg0: i32, %arg1: i32, %arg2: i32) -> i32 {
    %c0_i32 = arith.constant 0 : i32
    %c0_i32_0 = arith.constant 0 : i32
    return %c0_i32 : i32
  }
  func.func @transform_1(%arg0: i32, %arg1: i32, %arg2: i32) -> (i32, i32, i32) {
    %c0_i32 = arith.constant 0 : i32
    %c0_i32_0 = arith.constant 0 : i32
    return %arg0, %c0_i32, %arg2 : i32, i32, i32
  }
  func.func @transform_2(%arg0: i32, %arg1: i32, %arg2: i32) -> (i32, i32, i32) {
    %0 = arith.muli %arg1, %arg2 : i32
    %c0_i32 = arith.constant 0 : i32
    %c0_i32_0 = arith.constant 0 : i32
    return %arg0, %c0_i32, %0 : i32, i32, i32
  }
}

</mosaic_0001>

<bundles_post_ra>
// kernel: tpu_custom_call.1
= control target key start
LH: loop header
LB: loop body
LE: loop exit
PB: predicated region body
PF: predicated region fallthrough
CT: control target
= control target key end

     0   :  { %s1088_s0 = inlined_call_operand.<no memory space> [shape: f32[1], index: 0, kind: input, shape index: {}]   ;;  %s1089_s1 = inlined_call_operand.hbm [shape: f32[2,8,256], index: 1, kind: input, shape index: {}]   ;;  %s1090_s2 = inlined_call_operand.hbm [shape: f32[2,8,256], index: 2, kind: output, shape index: {}]  }
   0x1   :  { %1095 = sst [smem:[#allocation16_spill]] %s1089_s1 }
   0x2   :  { %7 = sst [smem:[#allocation5]] %s1088_s0 }
   0x3   :  { %8 = vsyncpa [#allocation7], 0 }
   0x4   :  { %10 = vsyncpa [#allocation7 + $0x1], 0 }
   0x5   :  { %11 = vsyncpa [#allocation8], 0 }
   0x6   :  { %13 = vsyncpa [#allocation8 + $0x1], 0  ;;  %s850_s11 = smov 0   ;;  %s852_s12 = smov 0  }
   0x7   :  { %s854_s13 = smov 0   ;;  %s856_s14 = smov 0  }
   0x8   :  { %s858_s15 = smov 0   ;;  %s860_s16 = smov 0  }
   0x9   :  { %s862_s17 = smov 0   ;;  %s864_s18 = smov 0  }
   0xa   :  { %s866_s0 = smov 0   ;;  %s868_s19 = smov 0  }
   0xb   :  { %s870_s20 = smov 0   ;;  %s872_s21 = smov 0  }
   0xc   :  { %s874_s22 = smov 0  }
   0xd LB: > { %1096 = sst [smem:[#allocation12_spill]] %s814_s20  ;;  %s496_s23 = sadd.s32 4294967295, %s822_s22   ;;  %s822_s22 = sphi %s874_s22, %s19_s22   ;;  %s818_s21 = sphi %s872_s21, %s1121_s21   ;;  %s814_s20 = sphi %s870_s20, %s1110_s20   ;;  %s810_s19 = sphi %s868_s19, %s1120_s19   ;;  %s806_s0 = sphi %s866_s0, %s1119_s0   ;;  %s802_s18 = sphi %s864_s18, %s1108_s18   ;;  %s798_s17 = sphi %s862_s17, %s1118_s17   ;;  %s794_s16 = sphi %s860_s16, %s1117_s16   ;;  %s790_s15 = sphi %s858_s15, %s1116_s15   ;;  %s786_s14 = sphi %s856_s14, %s1115_s14   ;;  %s782_s13 = sphi %s854_s13, %s1114_s13   ;;  %s778_s12 = sphi %s852_s12, %s1113_s12   ;;  %s774_s11 = sphi %s850_s11, %s1112_s11  }
   0xe   : > { %s497_s24 = sadd.s32 4294967294, %s822_s22   ;;  %s31_s25 = sadd.s32 1, %s810_s19 }
   0xf   : > { %s34_s26 = sadd.s32 1, %s814_s20  ;;  %p32_p0 = scmp.ge.s32.totalorder %s31_s25, 2 }
  0x10   : > { %s38_s27 = sadd.s32 1, %s818_s21  ;;  %s68_s28 = sadd.s32 1, %s794_s16 }
  0x11   : > { %p75_p1 = scmp.ne.s32.totalorder %s794_s16, %s790_s15  ;;  %s1123_s25 = smov (%p32_p0, %s31_s25), 0 }
  0x12   : > { %1097 = sst [smem:[#allocation13_spill]] %s1123_s25  ;;  %s1125_s26 = smov (!%p32_p0, %s34_s26), %s814_s20 }
  0x13   : > { %s64_s29 = ssub.s32 %s810_s19, %s1123_s25  ;;  %p76_p2 = scmp.eq.s32.totalorder %s822_s22, 0 }
  0x14   : > { %p36_p3 = scmp.ge.s32.totalorder %s1125_s26, 2  ;;  %p81_p4 = scmp.ne.s32.totalorder %s790_s15, %s786_s14 }
  0x15   : > { %p928_p5 = por %p76_p2, %p75_p1  ;;  %p82_p6 = scmp.eq.s32.totalorder %s496_s23, 0 }
  0x16   : > { %s1127_s26 = smov (%p36_p3, %s1125_s26), 0  ;;  %s1129_s27 = smov (!%p36_p3, %s38_s27), %s818_s21 }
  0x17   : > { %1099 = sst [smem:[#allocation14_spill]] %s1127_s26  ;;  %p935_p7 = por %p82_p6, %p81_p4 }
  0x18   : > { %s91_s4 = smul.u32 %s810_s19, %s814_s20  ;;  %p40_p8 = scmp.ge.s32.totalorder %s1129_s27, 2 }
  0x19   : > { %s92_s5 = smul.u32 %s1127_s26, %s1123_s25  ;;  %s98_s6 = sadd.s32 1, %s782_s13 }
  0x1a   : > { %p108_p9 = scmp.ne.s32.totalorder %s782_s13, %s778_s12  ;;  %s1131_s27 = smov (%p40_p8, %s1129_s27), 0 }
  0x1b   : > { %1101 = sst [smem:[#allocation15_spill]] %s1131_s27  ;;  %s94_s7 = ssub.s32 %s91_s4, %s92_s5 }
  0x1c   : > { %p109_p10 = scmp.eq.s32.totalorder %s496_s23, 7  ;;  %s63_s8 = ssub.s32 %s818_s21, %s1131_s27 }
  0x1d   : > { %p114_p11 = scmp.ne.s32.totalorder %s778_s12, %s774_s11  ;;  %s65_s9 = sor.u32 %s64_s29, %s63_s8 }
  0x1e   : > { %s95_s10 = sor.u32 %s94_s7, %s63_s8  ;;  %p66_p12 = scmp.eq.s32.totalorder %s65_s9, 0 }
  0x1f   : > { %p96_p13 = scmp.eq.s32.totalorder %s95_s10, 0  ;;  %p952_p0 = por %p109_p10, %p108_p9 }
  0x20   : > { %p115_p1 = scmp.eq.s32.totalorder %s497_s24, 7  ;;  %p541_p3 = scmp.lt.s32.totalorder %s822_s22, 8 }
  0x21   : > { %s961_s4 = scalar_select %p66_p12, %s794_s16, %s68_s28  }
  0x22   : > { %s964_s23 = scalar_select %p96_p13, %s782_s13, %s98_s6  }
  0x23   : > { %p966_p2 = por %p115_p1, %p114_p11  ;;  %s138_s29 = sand.u32 1, %s794_s16  }
  0x24   : > { %s500_s7 = sshll.u32 %s138_s29, 3  ;;  %s501_s8 = sshll.u32 %s818_s21, 1 }
  0x25   : > { %s1103_s5 = scalar_select %p966_p2, 1, 0 }
  0x26   : > { %s147_s9 = sadd.s32 %s810_s19, %s501_s8  ;;  %s142_s10 = scalar_lea.vmem [#allocation6], %s500_s7 }
  0x27   : > { %s151_s27 = sshll.u32 %s142_s10, 4  ;;  %s502_s26 = sshll.u32 %s147_s9, 7  ;;  %s152_s27 = int_to_ptr.vmem [resolvable:$true] %s151_s27 }
  0x28   : > { %s1104_s1 = sld [smem:[#allocation16_spill]]  ;;  %p979_p4 = pnand %p541_p3, %p928_p5 }
  0x29   : > { %p503_p6 = scmp.ge.s32.totalorder %s822_s22, 1  ;;  %p156_p8 = scmp.lt.s32.totalorder %s822_s22, 9 }
  0x2a   : > { %s139_s20 = scalar_lea.sflag [#allocation7], %s138_s29  ;;  %p660_p9 = pneg %p979_p4 }
  0x2b   : > { %s671_s8 = scalar_lea.vmem %s152_s27, 128  ;;  %s824_s7 = smov [#allocation6]  }
  0x2c   : > { %p672_p10 = scmp.ne.s32.totalorder %s152_s27, %s671_s8  ;;  %s676_s9 = sshll.u32 %s824_s7, 4  ;;  %s677_s9 = int_to_ptr.vmem [resolvable:$false] %s676_s9 }
  0x2d   : > { %s678_s25 = scalar_lea.vmem %s677_s9, 256  ;;  %p679_p13 = scmp.lt.s32.totalorder %s152_s27, %s677_s9 }
  0x2e   : > { %s149_s28 = scalar_lea.hbm %s1104_s1, %s502_s26  ;;  %p674_p11 = pnand %p672_p10, %p660_p9 }
  0x2f   : > { %p680_p1 = scmp.lt.s32.totalorder %s678_s25, %s671_s8 }
  0x30   : > { %p675_p12 = pneg %p674_p11 }
  0x31   : > { %p681_p5 = por %p680_p1, %p679_p13 }
  0x33   : > { %p682_p3 = pnand %p681_p5, %p675_p12 }
  0x35   : > { %685 = shalt.err (!%p682_p3)
}
  0x36   : > { %536 = dma.hbm_to_vmem [thread:$0]  (!%p979_p4), %s149_s28, 128, %s152_s27, %s139_s20  }
  0x37   : > { %p157_p2 = pnand %p503_p6, %p156_p8 }
  0x38   : > { %s162_s26 = sand.u32 (!%p157_p2), 1, %s790_s15  }
  0x39   : > { %160 = sbr.rel (%p157_p2) target bundleno = 839 (0x347), region = 28  ;;  %s504_s30 = sshll.u32 (!%p157_p2), %s162_s26, 3 }
  0x3a   : > { %s163_s29 = scalar_lea.sflag (!%p157_p2), [#allocation7], %s162_s26  ;;  %s166_s10 = scalar_lea.vmem (!%p157_p2), [#allocation6], %s504_s30 }
  0x3e   : > { %765 = dma.done.wait (%p935_p7), %s163_s29, 128  }
  0x3f   : > { %767 = vsyncadd (%p935_p7), %s163_s29, 4294967168  ;;  %s184_s24 = sand.u32 1, %s778_s12   ;;  %v1003_v0 = vld [vmem:[%s166_s10] sm:$0xff]  ;;  %p506_p2 = scmp.ne.s32.totalorder %s802_s18, 0 }
  0x40   : > { %s1001_s20 = sshll.u32 %s184_s24, 3  ;;  %p507_p4 = scmp.ne.s32.totalorder (!%p506_p2), %s798_s17, 0 }
  0x41   : > { %s186_s27 = scalar_lea.vmem [#allocation9], %s1001_s20  ;;  %192 = sbr.rel (%p506_p2) target bundleno = 278 (0x116), region = 36 }
  0x46   : > { %196 = sbr.rel (%p507_p4) target bundleno = 77 (0x4d), region = 40 }
  0x4b   : > { %vm197_vm0 = vcmask 64512   ;;  %v825_v1 = vmov 0.0  }
  0x4c   : > { %198 = vst.msk [vmem:[#allocation2] sm:$0xff] %vm197_vm0, %v825_v1 }
  0x4d PF: > { %v826_v2 = vmov 0.0   ;;  %vm827_vm1 = vmmov 0   ;;  %vm271_vm2 = vcmask 64512  }
  0x4e   : > { %519 = vmatprep.subr.mxu0 %v826_v2  ;;  %521 = vmatprep.mubr.msk.f32.mxu0 %vm827_vm1, %v826_v2 }
  0x4f   : > { %520 = vmatpush3.xpose.msra.mxu0 %v1003_v0 }
  0x52   : > { %522 = vmatmul.mubr.f32.vlgmr.msra.gmra.mxu0 %v1003_v0 }
  0x53   : > { %v199_v3 = vld [vmem:[#allocation2] sm:$0xff] }
 0x112   : > { %v266_v4 = vpop.f32.mrf.mxu0 }
 0x113   : > { %v270_v5 = vadd.f32 %v266_v4, %v199_v3 }
 0x114   : > { %v523_v6 = vpop.f32.mrf.mxu0 }
 0x115   : > { %272 = vst.msk [vmem:[#allocation2] sm:$0xff] %vm271_vm2, %v270_v5 }
 0x116 PF: > { %p273_p7 = scmp.eq.s32.totalorder %s802_s18, 1  ;;  %p274_p6 = scmp.eq.s32.totalorder %s798_s17, 0 }
 0x118   : > { %p275_p8 = pnand %p274_p6, %p273_p7 }
 0x119   : > { %s295_s3 = sld [smem:[#allocation5]] (!%p275_p8) }
 0x11a   : > { %278 = sbr.rel (%p275_p8) target bundleno = 606 (0x25e), region = 44 }
 0x11f   : > { %v280_v7 = vlaneseq  ;;  %v279_v8 = vld [vmem:[#allocation2] sm:$0xff]  ;;  %vm284_vm3 = vcmask 64512   ;;  %v297_v18 = vstv %s295_s3  ;;  %vm299_vm5 = vcmask 7168  }
 0x121   : > { %v281_v9 = vand.u32 127, %v280_v7 }
 0x123   : > { %vm282_vm4 = vcmp.lt.s32.totalorder %v281_v9, 4 }
 0x124   : > { %v283_v10 = vsel %vm282_vm4, %v279_v8, 1e+30 }
 0x125   : > { %v285_v11 = vsel %vm284_vm3, %v283_v10, inf }
 0x126   : > { %286 = vmin.xlane.f32.xlu0 %v285_v11 }
 0x1af   : > { %v287_v12 = vpop.xlane.xlu0 %286 }
 0x1b0   : > { %v288_v13 = vsub.f32 %v287_v12, %v283_v10 }
 0x1b2   : > { %v289_v14 = vmul.f32 1.442695, %v288_v13 }
 0x1b4   : > { %653 = vpow2.f32 %v289_v14 }
 0x1c1   : > { %v654_v15 = vpop.eup %653 }
 0x1c2   : > { %294 = vst.msk [vmem:[#allocation3] sm:$0xff] %vm284_vm3, %v654_v15  ;;  %v291_v16 = vsel %vm284_vm3, %v654_v15, 0.0 }
 0x1c3   : > { %292 = vadd.xlane.f32.xlu0 %v291_v16 }
 0x24c   : > { %v293_v17 = vpop.xlane.xlu0 %292 }
 0x24d   : > { %655 = vrcp.f32 %v293_v17 }
 0x25a   : > { %v656_v19 = vpop.eup %655 }
 0x25b   : > { %v298_v20 = vmul.f32 %v656_v19, %v297_v18 }
 0x25d   : > { %300 = vst.msk [vmem:[#allocation4] sm:$0xff] %vm299_vm5, %v298_v20 }
 0x25e PF: > { %p508_p9 = scmp.ne.s32.totalorder %s802_s18, 1 }
 0x260   : > { %303 = sbr.rel (%p508_p9) target bundleno = 814 (0x32e), region = 48 }
 0x265   : > { %v304_v21 = vld [vmem:[#allocation3] sm:$0xff]  ;;  %vm305_vm6 = vcmask 64512   ;;  %v379_v22 = vld [vmem:[#allocation4] sm:$0xff]  ;;  %v828_v23 = vmov 0.0   ;;  %vm829_vm7 = vmmov 0   ;;  %v830_v24 = vmov 0  }
 0x266   : > { %524 = vmatprep.subr.mxu0 %v828_v23  ;;  %526 = vmatprep.mubr.msk.f32.mxu0 %vm829_vm7, %v828_v23 }
 0x267   : > { %525 = vmatpush3.msra.mxu0 %v1003_v0  ;;  %657 = vset.pattern.permute.xlu0 %v830_v24 }
 0x268   : > { %527 = vmatmul.mubr.msk.f32.vlgmr.msra.gmra.mxu0 %vm305_vm6, %v304_v21  ;;  %382 = vperm.xlu0 %657, %v379_v22  }
 0x2e3   : > { %v383_v25 = vpop.permute.xlu0 %382 }
 0x328   : > { %v375_v26 = vpop.f32.mrf.mxu0 }
 0x329   : > { %v385_v27 = vmul.f32 %v383_v25, %v375_v26 }
 0x32a   : > { %v528_v28 = vpop.f32.mrf.mxu0 }
 0x32b   : > { %v386_v29 = vadd.f32 %v385_v27, %v1003_v0 }
 0x32d   : > { %387 = vst [vmem:[%s186_s27] sm:$0xff] %v386_v29 }
 0x32e PF: > { %s396_s28 = smul.u32 %s798_s17, %s802_s18  ;;  %s511_s6 = sshll.u32 %s806_s0, 1 }
 0x32f   : > { %s405_s8 = sshll.u32 %s186_s27, 4  ;;  %s389_s29 = scalar_lea.sflag [#allocation8], %s184_s24  ;;  %s406_s8 = int_to_ptr.vmem [resolvable:$true] %s405_s8 }
 0x330   : > { %s401_s7 = sadd.s32 %s511_s6, %s396_s28  ;;  %s686_s10 = scalar_lea.vmem %s406_s8, 128 }
 0x331   : > { %s512_s9 = sshll.u32 %s401_s7, 7  ;;  %p687_p10 = scmp.ne.s32.totalorder %s406_s8, %s686_s10 }
 0x332   : > { %s403_s30 = scalar_lea.hbm %s1090_s2, %s512_s9  ;;  %s831_s3 = smov [#allocation9]  }
 0x333   : > { %p688_p11 = pnand %p687_p10, %p952_p0  ;;  %s690_s1 = sshll.u32 %s831_s3, 4  ;;  %s691_s1 = int_to_ptr.vmem [resolvable:$false] %s690_s1 }
 0x334   : > { %s692_s17 = scalar_lea.vmem %s691_s1, 256  ;;  %p693_p13 = scmp.lt.s32.totalorder %s406_s8, %s691_s1 }
 0x335   : > { %p689_p12 = pneg %p688_p11  ;;  %p694_p1 = scmp.lt.s32.totalorder %s692_s17, %s686_s10 }
 0x337   : > { %p695_p5 = por %p694_p1, %p693_p13 }
 0x339   : > { %p696_p3 = pnand %p695_p5, %p689_p12 }
 0x33b   : > { %699 = shalt.err (!%p696_p3)
}
 0x33c   : > { %s700_s18 = scalar_lea.hbm %s403_s30, 128  ;;  %s704_s20 = scalar_lea.hbm %s1090_s2, 512 }
 0x33d   : > { %p701_p2 = scmp.ne.s32.totalorder %s403_s30, %s700_s18  ;;  %p705_p6 = scmp.lt.s32.totalorder %s403_s30, %s1090_s2 }
 0x33e   : > { %p706_p8 = scmp.lt.s32.totalorder %s704_s20, %s700_s18 }
 0x33f   : > { %p702_p4 = pnand %p701_p2, %p952_p0 }
 0x340   : > { %p707_p9 = por %p706_p8, %p705_p6 }
 0x341   : > { %p703_p7 = pneg %p702_p4 }
 0x343   : > { %p708_p10 = pnand %p707_p9, %p703_p7 }
 0x345   : > { %711 = shalt.err (!%p708_p10)
}
 0x346   : > { %531 = dma.vmem_to_hbm [thread:$0]  (%p952_p0), %s406_s8, 128, %s403_s30, %s389_s29  }
 0x347 PF: > { %p542_p11 = scmp.ge.s32.totalorder %s822_s22, 2  ;;  %s417_s1 = sand.u32 1, %s774_s11  }
 0x348   : > { %p1106_p12 = scmp.ne.s32.totalorder %s1103_s5, 0  ;;  %s418_s6 = scalar_lea.sflag [#allocation8], %s417_s1 }
 0x34a   : > { %p538_p13 = pnand %p542_p11, %p1106_p12 }
 0x34c   : > { %p539_p1 = pneg %p538_p13 }
 0x34e   : > { %769 = dma.done.wait (%p539_p1), %s418_s6, 128  }
 0x34f   : > { %771 = vsyncadd (%p539_p1), %s418_s6, 4294967168  ;;  %s19_s22 = sadd.s32 1, %s822_s22   ;;  %s1108_s18 = sld [smem:[#allocation12_spill]] }
 0x350   : > { %p1044_p5 = scmp.ge.s32.totalorder %s19_s22, 10   ;;  %s1109_s5 = sld [smem:[#allocation13_spill]] }
 0x351   : > { %s1110_s20 = sld [smem:[#allocation14_spill]]  ;;  %s1112_s11 = smov %s778_s12 }
 0x352   : > { %s1111_s8 = sld [smem:[#allocation15_spill]]  ;;  %s1113_s12 = smov %s782_s13 }
 0x353   : > { %s1114_s13 = smov %s964_s23  ;;  %s1115_s14 = smov %s790_s15 }
 0x354   : > { %s1116_s15 = smov %s794_s16  ;;  %s1117_s16 = smov %s961_s4 }
 0x355   : > { %s1118_s17 = smov %s810_s19  ;;  %s1119_s0 = smov %s818_s21 }
 0x356   : > { %s1120_s19 = smov %s1109_s5  ;;  %18 = sbr.rel (!%p1044_p5) target bundleno = 13 (0xd), region = 89 }
 0x358   : > { %s1121_s21 = smov %s1111_s8 }
 0x35b   :  { %423 = vsyncpa [#allocation7], 1 }
 0x35c   :  { %425 = vsyncpa [#allocation7 + $0x1], 1 }
 0x35d   :  { %426 = vsyncpa [#allocation8], 1 }
 0x35e   :  { %428 = vsyncpa [#allocation8 + $0x1], 1 }

</bundles_post_ra>
